<compile_context>
chip_gen: v5e
topology: v5e:2x2
jax: 0.10.0
libtpu: 0.0.40
codegen_flags: <defaults>
</compile_context>

<pallas_src>
import jax
import jax.numpy as jnp
from jax.experimental import pallas as pl
from jax.experimental.pallas import tpu as pltpu

INPUT_SIZE = 1
OUTPUT_SIZE = 1

LANE = 1024            # lane width of the 2D slab (multiple of 128)
MAX_BLOCK_ROWS = 256   # (256, 1024) f32 = 1 MiB per buffer


def _round_up(v, m):
    return ((v + m - 1) // m) * m


def linear1x1_kernel(wb_ref, x_ref, o_ref):
    # wb_ref: SMEM (2,) f32 scalars [weight, bias]; x_ref/o_ref: (R, LANE) VMEM.
    # y = w * x + b  -- one VPU vmul+vadd per vreg; f32 compute, cast on store.
    w = wb_ref[0]
    b = wb_ref[1]
    xf = x_ref[...].astype(jnp.float32)
    o_ref[...] = (xf * w + b).astype(o_ref.dtype)


def linear_forward(x, weight, bias, *, lane=LANE, max_block_rows=MAX_BLOCK_ROWS):
    """nn.Linear(1, 1).forward: x [N, 1], weight [1, 1], bias [1] -> [N, 1]."""
    n, in_f = x.shape
    out_f = weight.shape[0]
    assert in_f == INPUT_SIZE and out_f == OUTPUT_SIZE
    # TODO(synk): if in_features/out_features are ever generalized (>1), switch
    # to the tiled-MXU accumulator pattern with pre-transposed [in, out] weights.

    # Sublane+lane dense 2D slab: batch -> (rows_pad, lane), blocks of
    # (block_rows, lane) with block_rows a multiple of 8 sublanes.
    rows = pl.cdiv(n, lane)
    block_rows = min(max_block_rows, _round_up(rows, 8))
    rows_pad = _round_up(rows, block_rows)
    n_pad = rows_pad * lane
    grid = (rows_pad // block_rows,)

    x_flat = x.reshape(-1)                        # free (contiguous)
    padded = n_pad != n
    if padded:
        x_flat = jnp.pad(x_flat, (0, n_pad - n))  # only wrapper-side copy
    x2d = x_flat.reshape(rows_pad, lane)          # free (contiguous)

    # Weight / bias as two f32 SMEM scalars: no VMEM tile, no double-buffering,
    # and the FMA stays in f32 even for narrow input dtypes.
    wb = jnp.stack([weight.reshape(()), bias.reshape(())]).astype(jnp.float32)

    out_dtype = x.dtype
    in_bytes = jnp.dtype(x.dtype).itemsize
    out_bytes = jnp.dtype(out_dtype).itemsize
    cost = pl.CostEstimate(                        # memory-bound, padded counts
        flops=2 * n_pad,
        transcendentals=0,
        bytes_accessed=n_pad * (in_bytes + out_bytes) + 2 * 4,
    )

    y2d = pl.pallas_call(
        linear1x1_kernel,
        out_shape=jax.ShapeDtypeStruct((rows_pad, lane), out_dtype),
        grid=grid,
        in_specs=[
            pl.BlockSpec(memory_space=pltpu.MemorySpace.SMEM),   # [w, b] scalars
            pl.BlockSpec((block_rows, lane), lambda i: (i, 0)),  # x slab tile
        ],
        out_specs=pl.BlockSpec((block_rows, lane), lambda i: (i, 0)),
        compiler_params=pltpu.CompilerParams(
            # Independent tiles -> megacore sharding on v7x; no-op on v5e/v6e.
            dimension_semantics=("parallel",),
        ),
        cost_estimate=cost,
        # Donate the padded temp to the output (halves HBM footprint).  When no
        # pad copy was made, x2d aliases the caller's x -> do not donate.
        input_output_aliases={1: 0} if padded else {},
    )(wb, x2d)

    y_flat = y2d.reshape(-1)
    if padded:
        y_flat = y_flat[:n]
    return y_flat.reshape(n, out_f)


if __name__ == "__main__":
    key = jax.random.PRNGKey(0)
    kx, kw, kb, kx2 = jax.random.split(key, 4)

    # Deterministic parameter init (nn.Linear shapes: W [1, 1], b [1]).
    bound = 1.0 / (INPUT_SIZE ** 0.5)
    weight = jax.random.uniform(
        kw, (OUTPUT_SIZE, INPUT_SIZE), jnp.float32, -bound, bound
    )
    bias = jax.random.uniform(kb, (OUTPUT_SIZE,), jnp.float32, -bound, bound)

    # Case 1: ragged batch -> exercises the tail-pad + donated-output path
    # (single dense (8, 1024) block).
    n1 = 1000
    x1 = jax.random.normal(kx, (n1, INPUT_SIZE), jnp.float32)
    out1 = jax.block_until_ready(linear_forward(x1, weight, bias))
    ref1 = x1 @ weight.T + bias[None, :]
    assert out1.shape == (n1, OUTPUT_SIZE)
    assert jnp.allclose(out1, ref1, atol=1e-5, rtol=1e-5)

    # Case 2: slab-aligned batch -> no pad / no slice copies, and a multi-step
    # "parallel" grid (max_block_rows=8 -> 3 tiles of (8, 1024)).
    n2 = 24 * 1024
    x2 = jax.random.normal(kx2, (n2, INPUT_SIZE), jnp.float32)
    out2 = jax.block_until_ready(linear_forward(x2, weight, bias, max_block_rows=8))
    ref2 = x2 @ weight.T + bias[None, :]
    assert out2.shape == (n2, OUTPUT_SIZE)
    assert jnp.allclose(out2, ref2, atol=1e-5, rtol=1e-5)

    print("KERNEL_OK")
</pallas_src>

<mosaic_0001>
module attributes {stable_mosaic.version = 11 : i64} {
  func.func @linear1x1_kernel(%arg0: i32, %arg1: memref<2xf32, #tpu.memory_space<smem>>, %arg2: memref<8x1024xf32, #tpu.memory_space<vmem>>, %arg3: memref<8x1024xf32, #tpu.memory_space<vmem>>) attributes {dimension_semantics = [#tpu.dimension_semantics<parallel>], iteration_bounds = array<i64: 1>, scalar_prefetch = 0 : i64, scratch_operands = 0 : i64, tpu.core_type = #tpu.core_type<tc>, window_params = [{transform_indices = @transform_0, window_bounds = array<i64: 2>}, {transform_indices = @transform_1, window_bounds = array<i64: 8, 1024>}, {transform_indices = @transform_2, window_bounds = array<i64: 8, 1024>}]} {
    %c0 = arith.constant 0 : index
    %0 = memref.load %arg1[%c0] : memref<2xf32, #tpu.memory_space<smem>>
    %c1 = arith.constant 1 : index
    %1 = memref.load %arg1[%c1] : memref<2xf32, #tpu.memory_space<smem>>
    %c0_0 = arith.constant 0 : index
    %c0_1 = arith.constant 0 : index
    %2 = vector.load %arg2[%c0_0, %c0_1] : memref<8x1024xf32, #tpu.memory_space<vmem>>, vector<8x1024xf32>
    %3 = vector.broadcast %0 : f32 to vector<8x1024xf32>
    %4 = arith.mulf %2, %3 : vector<8x1024xf32>
    %5 = vector.broadcast %1 : f32 to vector<8x1024xf32>
    %6 = arith.addf %4, %5 : vector<8x1024xf32>
    %c0_2 = arith.constant 0 : index
    %c0_3 = arith.constant 0 : index
    %7 = vector.load %arg3[%c0_2, %c0_3] : memref<8x1024xf32, #tpu.memory_space<vmem>>, vector<8x1024xf32>
    tpu.vector_store %arg3[%c0_2, %c0_3], %6 {strides = array<i32>} : memref<8x1024xf32, #tpu.memory_space<vmem>>, vector<8x1024xf32>,
    return
  }
  func.func @transform_0(%arg0: i32) -> i32 {
    %c0_i32 = arith.constant 0 : i32
    %c0_i32_0 = arith.constant 0 : i32
    return %c0_i32 : i32
  }
  func.func @transform_1(%arg0: i32) -> (i32, i32) {
    %c0_i32 = arith.constant 0 : i32
    %c0_i32_0 = arith.constant 0 : i32
    return %arg0, %c0_i32 : i32, i32
  }
  func.func @transform_2(%arg0: i32) -> (i32, i32) {
    %c0_i32 = arith.constant 0 : i32
    %c0_i32_0 = arith.constant 0 : i32
    return %arg0, %c0_i32 : i32, i32
  }
}

</mosaic_0001>

<bundles_post_ra>
// kernel: tpu_custom_call.1
= control target key start
LH: loop header
LB: loop body
LE: loop exit
PB: predicated region body
PF: predicated region fallthrough
CT: control target
= control target key end

     0   :  { %7 = vsyncpa [#allocation5], 0  ;;  %s190_s0 = inlined_call_operand.vmem [shape: f32[2], index: 0, kind: input, shape index: {}]   ;;  %s191_s1 = inlined_call_operand.hbm [shape: f32[8,1024], index: 1, kind: input, shape index: {}, may-alias: {1,2}]   ;;  %s192_s2 = inlined_call_operand.hbm [shape: f32[8,1024], index: 2, kind: output, shape index: {}, may-alias: {1,2}]  }
   0x1   :  { %8 = vsyncpa [#allocation3], 0 }
   0x2   :  { %9 = vsyncpa [#allocation4], 0  ;;  %s15_s11 = sshll.u32 %s190_s0, 4  ;;  %s24_s14 = sshll.u32 %s191_s1, 4  ;;  %s16_s11 = int_to_ptr.vmem [resolvable:$true] %s15_s11  ;;  %s25_s14 = int_to_ptr.hbm [resolvable:$true] %s24_s14 }
   0x3   :  { %s163_s15 = smov [#allocation2]   ;;  %s164_s16 = smov [#allocation6]  }
   0x4   :  { %18 = dma.vmem_to_smem %s16_s11, 16, %s163_s15, [#allocation5]  }
   0x5   :  { %s26_s17 = sshll.u32 %s164_s16, 4  ;;  %s27_s17 = int_to_ptr.vmem [resolvable:$true] %s26_s17 }
   0x6   :  { %29 = dma.hbm_to_vmem [thread:$0]  %s25_s14, 1024, %s27_s17, [#allocation3]  }
   0x7   :  { %157 = dma.done.wait [#allocation5], 16  }
   0x8   :  { %158 = vsyncadd [#allocation5], 4294967280 }
   0x9   :  { %159 = dma.done.wait [#allocation3], 1024  }
   0xa   :  { %160 = vsyncadd [#allocation3], 4294966272 }
   0xb   :  { %38 = sfence }
   0xc   :  { %s39_s18 = sld [smem:[#allocation2]]  ;;  %v41_v0 = vld [vmem:[#allocation6] sm:$0xff]  ;;  %v42_v1 = vld [vmem:[#allocation6 + $0x8] sm:$0xff]  ;;  %v43_v2 = vld [vmem:[#allocation6 + $0x10] sm:$0xff]  ;;  %s165_s0 = smov [#allocation7]  }
   0xd   :  { %s93_s19 = sld [smem:[#allocation2 + $0x1]]  ;;  %v44_v3 = vld [vmem:[#allocation6 + $0x18] sm:$0xff]  ;;  %v45_v4 = vld [vmem:[#allocation6 + $0x20] sm:$0xff]  ;;  %v46_v5 = vld [vmem:[#allocation6 + $0x28] sm:$0xff]  ;;  %s80_s1 = sshll.u32 %s165_s0, 4  ;;  %s81_s1 = int_to_ptr.vmem [resolvable:$true] %s80_s1 }
   0xe   :  { %v47_v7 = vld [vmem:[#allocation6 + $0x30] sm:$0xff]  ;;  %v48_v12 = vld [vmem:[#allocation6 + $0x38] sm:$0xff]  ;;  %s82_s22 = sshll.u32 %s192_s2, 4  ;;  %s83_s22 = int_to_ptr.hbm [resolvable:$true] %s82_s22 }
  0x12   :  { %v49_v6 = vstv %s39_s18 }
  0x13   :  { %v50_v8 = vmul.f32 %v49_v6, %v41_v0  ;;  %v58_v9 = vstv %s93_s19  ;;  %v51_v10 = vmul.f32 %v49_v6, %v42_v1  ;;  %v52_v11 = vmul.f32 %v49_v6, %v43_v2 }
  0x14   :  { %v53_v13 = vmul.f32 %v49_v6, %v44_v3  ;;  %v54_v14 = vmul.f32 %v49_v6, %v45_v4  ;;  %v55_v15 = vmul.f32 %v49_v6, %v46_v5  ;;  %v56_v19 = vmul.f32 %v49_v6, %v47_v7 }
  0x15   :  { %v59_v16 = vadd.f32 %v58_v9, %v50_v8  ;;  %v60_v17 = vadd.f32 %v58_v9, %v51_v10  ;;  %v61_v18 = vadd.f32 %v58_v9, %v52_v11  ;;  %v57_v21 = vmul.f32 %v49_v6, %v48_v12 }
  0x16   :  { %v62_v20 = vadd.f32 %v58_v9, %v53_v13  ;;  %v63_v22 = vadd.f32 %v58_v9, %v54_v14  ;;  %v64_v23 = vadd.f32 %v58_v9, %v55_v15  ;;  %v65_v24 = vadd.f32 %v58_v9, %v56_v19 }
  0x17   :  { %67 = vst [vmem:[#allocation7] sm:$0xff] %v59_v16  ;;  %v66_v25 = vadd.f32 %v58_v9, %v57_v21 }
  0x18   :  { %68 = vst [vmem:[#allocation7 + $0x8] sm:$0xff] %v60_v17 }
  0x19   :  { %69 = vst [vmem:[#allocation7 + $0x10] sm:$0xff] %v61_v18 }
  0x1a   :  { %70 = vst [vmem:[#allocation7 + $0x18] sm:$0xff] %v62_v20 }
  0x1b   :  { %71 = vst [vmem:[#allocation7 + $0x20] sm:$0xff] %v63_v22 }
  0x1c   :  { %72 = vst [vmem:[#allocation7 + $0x28] sm:$0xff] %v64_v23 }
  0x1d   :  { %73 = vst [vmem:[#allocation7 + $0x30] sm:$0xff] %v65_v24 }
  0x1e   :  { %74 = vst [vmem:[#allocation7 + $0x38] sm:$0xff] %v66_v25 }
  0x1f   :  { %85 = dma.vmem_to_hbm [thread:$0]  %s81_s1, 1024, %s83_s22, [#allocation4]  }
  0x20   :  { %161 = dma.done.wait [#allocation4], 1024  }
  0x21   :  { %162 = vsyncadd [#allocation4], 4294966272 }
  0x22   :  { %90 = vsyncpa [#allocation3], 1 }
  0x23   :  { %91 = vsyncpa [#allocation4], 1 }
  0x24   :  { %92 = vsyncpa [#allocation5], 1 }

</bundles_post_ra>
